<compile_context>
chip_gen: v7x
topology: tpu7x:2x2x1
jax: 0.10.0
libtpu: 0.0.40
codegen_flags: <defaults>
</compile_context>

<pallas_src>
import functools

import jax
import jax.numpy as jnp
from jax.experimental import pallas as pl
from jax.experimental.pallas import tpu as pltpu


def softmax_body_kernel(logits_ref, u_ref, prefix_ref, gsum_ref, gbcast_ref,
                        actions_ref, *, temp, A):
    # Lane-packed tile: (TBp, 128) with G = 128 // A original rows per lane-row.
    x = logits_ref[...].astype(jnp.float32) * temp                 # (TBp, 128)

    # Overflow guard: subtract the max of each 128-lane row (covers the G batch rows
    # packed into it).  softmax is shift-invariant, so the draw is unchanged.
    # TODO(synk): this relaxes F.softmax's per-row max to a per-G-row max; it only
    # matters if scaled logits of G consecutive rows differ by > ~80 nats (f32 exp
    # underflow), in which case the weaker rows would degenerate to action 0.
    m = jnp.max(x, axis=-1, keepdims=True)                         # 1 XLU reduce / vreg
    e = jnp.exp(x - m)                                             # unnormalized probs

    # Per-lane inclusive prefix sums within each A-lane group (MXU, block-diag ones).
    cdf = jnp.dot(e, prefix_ref[...], preferred_element_type=jnp.float32)   # (TBp, 128)
    # Per-row total mass via MXU instead of an XLU reduce.
    denom = jnp.dot(e, gsum_ref[...], preferred_element_type=jnp.float32)   # (TBp, G)

    # Inverse-CDF draw without normalizing: count prefix entries below u * denom.
    thresh_g = u_ref[...].astype(jnp.float32) * denom                       # (TBp, G)
    thresh = jnp.dot(thresh_g, gbcast_ref[...],
                     preferred_element_type=jnp.float32)                    # (TBp, 128)
    ind = (cdf < thresh).astype(jnp.float32)
    counts = jnp.dot(ind, gsum_ref[...], preferred_element_type=jnp.float32)  # (TBp, G)

    # Clamp fp edge cases (u*denom >= total mass) and store as int32.
    actions_ref[...] = jnp.minimum(counts, float(A - 1)).astype(jnp.int32)


def softmax_body(logits, uniforms, temp, *, block_rows=16384):
    """Sample actions ~ softmax(temp * logits) per row.

    logits:   (B, A) float32 or bfloat16; A must divide 128.
    uniforms: (B, 1) float32 in [0, 1) (externally supplied, deterministic).
    Returns   (B, 1) int32 action indices (torch.multinomial(1) semantics).
    """
    B, A = logits.shape
    if 128 % A != 0:
        # TODO(synk): general A needs per-row lane padding to the next divisor of 128
        # (or a fallback to the plain (B, A) layout).
        raise ValueError(f"action dim A={A} must divide 128 for the packed layout")
    G = 128 // A           # original rows packed per 128-lane row
    ralign = 8 * G         # batch-row granule: 8 sublanes x G rows per lane-row

    def _round_up(n, m):
        return ((n + m - 1) // m) * m

    # Batch tile (in original rows): as big as block_rows allows, but split into >=2
    # tiles when the batch is big enough so the "parallel" grid axis can shard across
    # both TensorCores on v7x (harmless on single-TC v5e/v6e).
    b_round = _round_up(B, ralign)
    tb = min(_round_up(block_rows, ralign), b_round)
    if b_round >= 2 * ralign and tb > b_round // 2:
        tb = _round_up(b_round // 2, ralign)
    Bp = _round_up(B, tb)

    # Pad with zero logits / zero uniforms.  Padding must stay FINITE: padded rows
    # then deterministically sample action 0 and are sliced off; -inf padding would
    # produce NaNs through exp.
    if Bp != B:
        pad = Bp - B
        logits = jnp.pad(logits, ((0, pad), (0, 0)))
        uniforms = jnp.pad(uniforms, ((0, pad), (0, 0)))

    # Free, row-major-contiguous reshapes into the lane-packed layout.
    logits_p = logits.reshape(Bp // G, 128)
    u_p = uniforms.reshape(Bp // G, G)

    # Resident 0/1 matrices (built once, outside the kernel).
    lane = jnp.arange(128)
    grp = lane // A                      # which packed row a lane belongs to
    pos = lane % A                       # action index within that row
    prefix = ((grp[:, None] == grp[None, :]) &
              (pos[:, None] <= pos[None, :])).astype(jnp.float32)   # (128, 128)
    gsum = (grp[:, None] == jnp.arange(G)[None, :]).astype(jnp.float32)  # (128, G)
    gbcast = gsum.T                                                      # (G, 128)

    tbp = tb // G
    kern = functools.partial(softmax_body_kernel, temp=float(temp), A=A)
    out = pl.pallas_call(
        kern,
        out_shape=jax.ShapeDtypeStruct((Bp // G, G), jnp.int32),
        grid=(Bp // tb,),
        in_specs=[
            pl.BlockSpec((tbp, 128), lambda i: (i, 0)),   # packed logits tile
            pl.BlockSpec((tbp, G), lambda i: (i, 0)),     # packed uniforms tile
            pl.BlockSpec((128, 128), lambda i: (0, 0)),   # prefix matrix (resident)
            pl.BlockSpec((128, G), lambda i: (0, 0)),     # group-sum selector (resident)
            pl.BlockSpec((G, 128), lambda i: (0, 0)),     # group-broadcast (resident)
        ],
        out_specs=pl.BlockSpec((tbp, G), lambda i: (i, 0)),
        compiler_params=pltpu.CompilerParams(
            dimension_semantics=("parallel",),            # shard batch across TCs (v7x)
        ),
    )(logits_p, u_p, prefix, gsum, gbcast)
    return out.reshape(Bp, 1)[:B]


def _bracket_ok(actions, logits, uniforms, temp, tol=5e-3):
    """Validate the sampled index against the reference softmax CDF bracket.

    An exact-equality check against a cumsum reference is fragile (MXU accumulation
    order differs from a cumsum near floating-point ties), so instead verify that
    cdf[a-1] <= u <= cdf[a] up to `tol`, which is the defining property of the draw.
    """
    x = logits.astype(jnp.float32) * temp
    p = jax.nn.softmax(x, axis=-1)
    cdf = jnp.cumsum(p, axis=-1)
    B = x.shape[0]
    a = actions[:, 0]
    u = uniforms[:, 0].astype(jnp.float32)
    rows = jnp.arange(B)
    lo = jnp.where(a == 0, 0.0, cdf[rows, jnp.maximum(a - 1, 0)])
    hi = cdf[rows, a]
    return bool(jnp.all((u >= lo - tol) & (u <= hi + tol)))


if __name__ == "__main__":
    TEMP = 7.0  # temperature (the module's __init__ arg)
    key = jax.random.PRNGKey(0)
    k1, k2, k3, k4 = jax.random.split(key, 4)

    # --- case 1: tiny f32 batch, single grid step ---
    B, A = 8, 16
    logits = jax.random.normal(k1, (B, A), dtype=jnp.float32)
    uniforms = jax.random.uniform(k2, (B, 1), dtype=jnp.float32)
    actions = jax.block_until_ready(softmax_body(logits, uniforms, TEMP))
    assert actions.shape == (B, 1) and actions.dtype == jnp.int32
    assert bool(jnp.all((actions >= 0) & (actions < A)))
    assert _bracket_ok(actions, logits, uniforms, TEMP)

    # --- case 2: bf16 logits, multi-tile grid + batch padding path ---
    B2 = 200
    logits2 = jax.random.normal(k3, (B2, A), dtype=jnp.float32).astype(jnp.bfloat16)
    uniforms2 = jax.random.uniform(k4, (B2, 1), dtype=jnp.float32)
    actions2 = jax.block_until_ready(
        softmax_body(logits2, uniforms2, TEMP, block_rows=128)
    )
    assert actions2.shape == (B2, 1) and actions2.dtype == jnp.int32
    assert bool(jnp.all((actions2 >= 0) & (actions2 < A)))
    assert _bracket_ok(actions2, logits2, uniforms2, TEMP)

    print("KERNEL_OK")
</pallas_src>

<mosaic_0001>
module attributes {stable_mosaic.version = 11 : i64} {
  func.func @softmax_body_kernel(%arg0: i32, %arg1: memref<8x128xf32, #tpu.memory_space<vmem>>, %arg2: memref<8x8xf32, #tpu.memory_space<vmem>>, %arg3: memref<128x128xf32, #tpu.memory_space<vmem>>, %arg4: memref<128x8xf32, #tpu.memory_space<vmem>>, %arg5: memref<8x128xf32, #tpu.memory_space<vmem>>, %arg6: memref<8x8xi32, #tpu.memory_space<vmem>>) attributes {dimension_semantics = [#tpu.dimension_semantics<parallel>], iteration_bounds = array<i64: 1>, scalar_prefetch = 0 : i64, scratch_operands = 0 : i64, tpu.core_type = #tpu.core_type<tc>, window_params = [{transform_indices = @transform_0, window_bounds = array<i64: 8, 128>}, {transform_indices = @transform_1, window_bounds = array<i64: 8, 8>}, {pipeline_mode = #tpu.pipeline_mode<synchronous>, transform_indices = @transform_2, window_bounds = array<i64: 128, 128>}, {pipeline_mode = #tpu.pipeline_mode<synchronous>, transform_indices = @transform_3, window_bounds = array<i64: 128, 8>}, {pipeline_mode = #tpu.pipeline_mode<synchronous>, transform_indices = @transform_4, window_bounds = array<i64: 8, 128>}, {transform_indices = @transform_5, window_bounds = array<i64: 8, 8>}]} {
    %c0 = arith.constant 0 : index
    %c0_0 = arith.constant 0 : index
    %0 = vector.load %arg1[%c0, %c0_0] : memref<8x128xf32, #tpu.memory_space<vmem>>, vector<8x128xf32>
    %cst = arith.constant 7.000000e+00 : f32
    %1 = vector.broadcast %cst : f32 to vector<8x128xf32>
    %2 = arith.mulf %0, %1 : vector<8x128xf32>
    %cst_1 = arith.constant dense<0xFF800000> : vector<8xf32>
    %3 = vector.multi_reduction <maximumf>, %2, %cst_1 [1] : vector<8x128xf32> to vector<8xf32>
    %4 = vector.shape_cast %3 : vector<8xf32> to vector<8x1xf32>
    %5 = vector.broadcast %4 : vector<8x1xf32> to vector<8x128xf32>
    %6 = arith.subf %2, %5 : vector<8x128xf32>
    %7 = math.exp %6 : vector<8x128xf32>
    %c0_2 = arith.constant 0 : index
    %c0_3 = arith.constant 0 : index
    %8 = vector.load %arg3[%c0_2, %c0_3] : memref<128x128xf32, #tpu.memory_space<vmem>>, vector<128x128xf32>
    %cst_4 = arith.constant dense<0.000000e+00> : vector<8x128xf32>
    %9 = tpu.matmul %7, %8, %cst_4 {dimension_numbers = #tpu.dot_dimension_numbers<[1], [0], [0], [1], [0, 0, 1, 1], [], []>} : vector<8x128xf32>, vector<128x128xf32>, vector<8x128xf32> -> vector<8x128xf32>
    %c0_5 = arith.constant 0 : index
    %c0_6 = arith.constant 0 : index
    %10 = vector.load %arg4[%c0_5, %c0_6] : memref<128x8xf32, #tpu.memory_space<vmem>>, vector<128x8xf32>
    %cst_7 = arith.constant dense<0.000000e+00> : vector<8x8xf32>
    %11 = tpu.matmul %7, %10, %cst_7 {dimension_numbers = #tpu.dot_dimension_numbers<[1], [0], [0], [1], [0, 0, 1, 1], [], []>} : vector<8x128xf32>, vector<128x8xf32>, vector<8x8xf32> -> vector<8x8xf32>
    %c0_8 = arith.constant 0 : index
    %c0_9 = arith.constant 0 : index
    %12 = vector.load %arg2[%c0_8, %c0_9] : memref<8x8xf32, #tpu.memory_space<vmem>>, vector<8x8xf32>
    %13 = arith.mulf %12, %11 : vector<8x8xf32>
    %c0_10 = arith.constant 0 : index
    %c0_11 = arith.constant 0 : index
    %14 = vector.load %arg5[%c0_10, %c0_11] : memref<8x128xf32, #tpu.memory_space<vmem>>, vector<8x128xf32>
    %cst_12 = arith.constant dense<0.000000e+00> : vector<8x128xf32>
    %15 = tpu.matmul %13, %14, %cst_12 {dimension_numbers = #tpu.dot_dimension_numbers<[1], [0], [0], [1], [0, 0, 1, 1], [], []>} : vector<8x8xf32>, vector<8x128xf32>, vector<8x128xf32> -> vector<8x128xf32>
    %16 = arith.cmpf olt, %9, %15 : vector<8x128xf32>
    %17 = arith.extui %16 : vector<8x128xi1> to vector<8x128xi32>
    %18 = arith.sitofp %17 : vector<8x128xi32> to vector<8x128xf32>
    %c0_13 = arith.constant 0 : index
    %c0_14 = arith.constant 0 : index
    %19 = vector.load %arg4[%c0_13, %c0_14] : memref<128x8xf32, #tpu.memory_space<vmem>>, vector<128x8xf32>
    %cst_15 = arith.constant dense<0.000000e+00> : vector<8x8xf32>
    %20 = tpu.matmul %18, %19, %cst_15 {dimension_numbers = #tpu.dot_dimension_numbers<[1], [0], [0], [1], [0, 0, 1, 1], [], []>} : vector<8x128xf32>, vector<128x8xf32>, vector<8x8xf32> -> vector<8x8xf32>
    %cst_16 = arith.constant 1.500000e+01 : f32
    %21 = vector.broadcast %cst_16 : f32 to vector<8x8xf32>
    %22 = arith.minimumf %20, %21 : vector<8x8xf32>
    %23 = arith.fptosi %22 : vector<8x8xf32> to vector<8x8xi32>
    %c0_17 = arith.constant 0 : index
    %c0_18 = arith.constant 0 : index
    %24 = vector.load %arg6[%c0_17, %c0_18] : memref<8x8xi32, #tpu.memory_space<vmem>>, vector<8x8xi32>
    tpu.vector_store %arg6[%c0_17, %c0_18], %23 {strides = array<i32>} : memref<8x8xi32, #tpu.memory_space<vmem>>, vector<8x8xi32>,
    return
  }
  func.func @transform_0(%arg0: i32) -> (i32, i32) {
    %c0_i32 = arith.constant 0 : i32
    %c0_i32_0 = arith.constant 0 : i32
    return %arg0, %c0_i32 : i32, i32
  }
  func.func @transform_1(%arg0: i32) -> (i32, i32) {
    %c0_i32 = arith.constant 0 : i32
    %c0_i32_0 = arith.constant 0 : i32
    return %arg0, %c0_i32 : i32, i32
  }
  func.func @transform_2(%arg0: i32) -> (i32, i32) {
    %c0_i32 = arith.constant 0 : i32
    %c0_i32_0 = arith.constant 0 : i32
    %c0_i32_1 = arith.constant 0 : i32
    return %c0_i32, %c0_i32_0 : i32, i32
  }
  func.func @transform_3(%arg0: i32) -> (i32, i32) {
    %c0_i32 = arith.constant 0 : i32
    %c0_i32_0 = arith.constant 0 : i32
    %c0_i32_1 = arith.constant 0 : i32
    return %c0_i32, %c0_i32_0 : i32, i32
  }
  func.func @transform_4(%arg0: i32) -> (i32, i32) {
    %c0_i32 = arith.constant 0 : i32
    %c0_i32_0 = arith.constant 0 : i32
    %c0_i32_1 = arith.constant 0 : i32
    return %c0_i32, %c0_i32_0 : i32, i32
  }
  func.func @transform_5(%arg0: i32) -> (i32, i32) {
    %c0_i32 = arith.constant 0 : i32
    %c0_i32_0 = arith.constant 0 : i32
    return %arg0, %c0_i32 : i32, i32
  }
}

</mosaic_0001>

<bundles_post_ra>
// kernel: tpu_custom_call.1
= control target key start
LH: loop header
LB: loop body
LE: loop exit
PB: predicated region body
PF: predicated region fallthrough
CT: control target
= control target key end

     0   :  { %10 = vsyncpa [#allocation3], 0  ;;  %s936_s0 = inlined_call_operand.vmem [shape: f32[8,128], index: 0, kind: input, shape index: {}]   ;;  %s937_s1 = inlined_call_operand.hbm [shape: f32[8,8], index: 1, kind: input, shape index: {}]   ;;  %s938_s2 = inlined_call_operand.vmem [shape: f32[128,128], index: 2, kind: input, shape index: {}]   ;;  %s939_s3 = inlined_call_operand.vmem [shape: f32[128,8], index: 3, kind: input, shape index: {}]   ;;  %s940_s4 = inlined_call_operand.hbm [shape: f32[8,128], index: 4, kind: input, shape index: {}]   ;;  %s941_s5 = inlined_call_operand.hbm [shape: s32[8,8], index: 5, kind: output, shape index: {}]  }
   0x1   :  { %11 = vsyncpa [#allocation6], 0 }
   0x2   :  { %12 = vsyncpa [#allocation4], 0  ;;  %s714_s18 = smov [#allocation2]   ;;  %s715_s20 = smov [#allocation5]  }
   0x3   :  { %s21_s19 = sshll.u32 %s714_s18, 4  ;;  %s35_s21 = sshll.u32 %s715_s20, 4  ;;  %s22_s19 = int_to_ptr.vmem [resolvable:$true] %s21_s19  ;;  %s36_s21 = int_to_ptr.vmem [resolvable:$true] %s35_s21 }
   0x4   :  { %s642_s24 = scalar_lea.hbm %s937_s1, 128 }
   0x5   :  { %p643_p0 = scmp.ne.s32.totalorder %s937_s1, %s642_s24  ;;  %p646_p1 = scmp.lt.u32.totalorder %s642_s24, %s937_s1 }
   0x7   :  { %p648_p2 = pnand %p646_p1, %p643_p0 }
   0x9   :  { %651 = shalt.err (!%p648_p2)
}
   0xa   :  { %s652_s29 = scalar_lea.vmem %s22_s19, 128  ;;  %p657_p4 = scmp.lt.s32.totalorder %s22_s19, %s22_s19 }
   0xb   :  { %p653_p3 = scmp.ne.s32.totalorder %s22_s19, %s652_s29  ;;  %p658_p5 = scmp.lt.s32.totalorder %s652_s29, %s652_s29 }
   0xd   :  { %p659_p6 = por %p658_p5, %p657_p4 }
   0xf   :  { %p660_p7 = pnand %p659_p6, %p653_p3 }
  0x11   :  { %663 = shalt.err (!%p660_p7)
}
  0x12   :  { %24 = dma.hbm_to_vmem [thread:$0]  %s937_s1, 128, %s22_s19, [#allocation3]  }
  0x13   :  { %s664_s9 = scalar_lea.hbm %s940_s4, 128 }
  0x14   :  { %p665_p8 = scmp.ne.s32.totalorder %s940_s4, %s664_s9  ;;  %p668_p9 = scmp.lt.u32.totalorder %s664_s9, %s940_s4 }
  0x16   :  { %p670_p10 = pnand %p668_p9, %p665_p8 }
  0x18   :  { %673 = shalt.err (!%p670_p10)
}
  0x19   :  { %s674_s14 = scalar_lea.vmem %s36_s21, 128  ;;  %p679_p12 = scmp.lt.s32.totalorder %s36_s21, %s36_s21 }
  0x1a   :  { %p675_p11 = scmp.ne.s32.totalorder %s36_s21, %s674_s14  ;;  %p680_p13 = scmp.lt.s32.totalorder %s674_s14, %s674_s14 }
  0x1c   :  { %p681_p0 = por %p680_p13, %p679_p12 }
  0x1e   :  { %p682_p1 = pnand %p681_p0, %p675_p11 }
  0x20   :  { %685 = shalt.err (!%p682_p1)
}
  0x21   :  { %38 = dma.hbm_to_vmem [thread:$0]  %s940_s4, 128, %s36_s21, [#allocation6]  }
  0x22   :  { %708 = dma.done.wait [#allocation3], 128  }
  0x23   :  { %709 = vsyncadd [#allocation3], 4294967168 }
  0x24   :  { %710 = dma.done.wait [#allocation6], 128  }
  0x25   :  { %711 = vsyncadd [#allocation6], 4294967168  ;;  %v716_v0 = vmov 0.0|0.0   ;;  %v45_v1 = vld [vmem:[%s936_s0] sm:$0xff]  ;;  %v53_v3 = vld [vmem:[%s938_s2 + $0x8] sm:$0xff]  ;;  %vm717_vm0 = vmmov 0  }
  0x26   :  { %559 = vmatprep.subr.bf16.mxu0 %v716_v0  ;;  %583 = vmatprep.subr.bf16.mxu1 %v716_v0  ;;  %v52_v2 = vld [vmem:[%s938_s2] sm:$0xff]  ;;  %v786_v4 = vmul.f32 7.0, %v45_v1  ;;  %v139_v7 = vld [vmem:[%s939_s3 + $0x8] sm:$0xff]  ;;  %v54_v8 = vld [vmem:[%s938_s2 + $0x10] sm:$0xff]  ;;  %v718_v43 = vmov 0.0   ;;  %vm227_vm1 = vcmask 64512  }
  0x27   :  { %v560_v5 = vpack.c.bf16 %v53_v3, %v52_v2  ;;  %v138_v6 = vld [vmem:[%s939_s3] sm:$0xff]  ;;  %v55_v10 = vld [vmem:[%s938_s2 + $0x18] sm:$0xff]  ;;  %v140_v11 = vld [vmem:[%s939_s3 + $0x10] sm:$0xff]  ;;  %481 = vmatprep.mubr.msk.f32.mxu0 %vm717_vm0, %v718_v43  ;;  %516 = vmatprep.mubr.msk.f32.mxu1 %vm717_vm0, %v718_v43  ;;  %v719_v2 = vmov 1.0  }
  0x28   :  { %v797_v9 = vpack.c.bf16 %v139_v7, %v138_v6  ;;  %v141_v12 = vld [vmem:[%s939_s3 + $0x18] sm:$0xff]  ;;  %47 = vmax.xlane.f32.xlu0 %v786_v4  ;;  %v563_v13 = vpack.c.bf16 %v55_v10, %v54_v8  ;;  %v56_v15 = vld [vmem:[%s938_s2 + $0x20] sm:$0xff]  ;;  %v57_v16 = vld [vmem:[%s938_s2 + $0x28] sm:$0xff] }
  0x29   :  { %561 = vmatpush3.bf16.msra.mxu0 %v560_v5  ;;  %v811_v14 = vpack.c.bf16 %v141_v12, %v140_v11  ;;  %v142_v17 = vld [vmem:[%s939_s3 + $0x20] sm:$0xff]  ;;  %v143_v18 = vld [vmem:[%s939_s3 + $0x28] sm:$0xff]  ;;  %v566_v19 = vpack.c.bf16 %v57_v16, %v56_v15  ;;  %v58_v21 = vld [vmem:[%s938_s2 + $0x30] sm:$0xff] }
  0x2a   :  { %585 = vmatpush3.bf16.msra.mxu1 %v797_v9  ;;  %562 = vmatprep.subr.bf16.mxu0 %v716_v0  ;;  %v828_v20 = vpack.c.bf16 %v143_v18, %v142_v17  ;;  %v59_v22 = vld [vmem:[%s938_s2 + $0x38] sm:$0xff]  ;;  %v144_v23 = vld [vmem:[%s939_s3 + $0x30] sm:$0xff]  ;;  %v60_v27 = vld [vmem:[%s938_s2 + $0x40] sm:$0xff] }
  0x2b   :  { %586 = vmatprep.subr.bf16.mxu1 %v716_v0  ;;  %v145_v24 = vld [vmem:[%s939_s3 + $0x38] sm:$0xff]  ;;  %v569_v25 = vpack.c.bf16 %v59_v22, %v58_v21  ;;  %v61_v28 = vld [vmem:[%s938_s2 + $0x48] sm:$0xff]  ;;  %v146_v29 = vld [vmem:[%s939_s3 + $0x40] sm:$0xff] }
  0x2c   :  { %v845_v26 = vpack.c.bf16 %v145_v24, %v144_v23  ;;  %v572_v30 = vpack.c.bf16 %v61_v28, %v60_v27  ;;  %v147_v31 = vld [vmem:[%s939_s3 + $0x48] sm:$0xff]  ;;  %v62_v33 = vld [vmem:[%s938_s2 + $0x50] sm:$0xff]  ;;  %v63_v34 = vld [vmem:[%s938_s2 + $0x58] sm:$0xff] }
  0x2d   :  { %564 = vmatpush3.bf16.msra.mxu0 %v563_v13  ;;  %v596_v32 = vpack.c.bf16 %v147_v31, %v146_v29  ;;  %v148_v35 = vld [vmem:[%s939_s3 + $0x50] sm:$0xff]  ;;  %v575_v36 = vpack.c.bf16 %v63_v34, %v62_v33  ;;  %v149_v37 = vld [vmem:[%s939_s3 + $0x58] sm:$0xff]  ;;  %v64_v39 = vld [vmem:[%s938_s2 + $0x60] sm:$0xff] }
  0x2e   :  { %588 = vmatpush3.bf16.msra.mxu1 %v811_v14  ;;  %565 = vmatprep.subr.bf16.mxu0 %v716_v0  ;;  %v599_v38 = vpack.c.bf16 %v149_v37, %v148_v35  ;;  %v65_v40 = vld [vmem:[%s938_s2 + $0x68] sm:$0xff]  ;;  %v150_v41 = vld [vmem:[%s939_s3 + $0x60] sm:$0xff]  ;;  %v66_v46 = vld [vmem:[%s938_s2 + $0x70] sm:$0xff] }
  0x2f   :  { %589 = vmatprep.subr.bf16.mxu1 %v716_v0  ;;  %v151_v42 = vld [vmem:[%s939_s3 + $0x68] sm:$0xff]  ;;  %v578_v44 = vpack.c.bf16 %v65_v40, %v64_v39  ;;  %v67_v47 = vld [vmem:[%s938_s2 + $0x78] sm:$0xff]  ;;  %v152_v48 = vld [vmem:[%s939_s3 + $0x70] sm:$0xff]  ;;  %s720_s2 = smov [#allocation7]  }
  0x30   :  { %v602_v45 = vpack.c.bf16 %v151_v42, %v150_v41  ;;  %v153_v49 = vld [vmem:[%s939_s3 + $0x78] sm:$0xff]  ;;  %v581_v50 = vpack.c.bf16 %v67_v47, %v66_v46  ;;  %v226_v55 = vld [vmem:[#allocation5] sm:$0xff]  ;;  %v224_v57 = vld [vmem:[#allocation2] sm:$0xff]  ;;  %s383_s3 = sshll.u32 %s720_s2, 4  ;;  %s384_s3 = int_to_ptr.vmem [resolvable:$true] %s383_s3 }
  0x31   :  { %567 = vmatpush3.bf16.msra.mxu0 %v566_v19  ;;  %v605_v51 = vpack.c.bf16 %v153_v49, %v152_v48  ;;  %s686_s0 = scalar_lea.vmem %s384_s3, 128  ;;  %p691_p3 = scmp.lt.s32.totalorder %s384_s3, %s384_s3 }
  0x32   :  { %591 = vmatpush3.bf16.msra.mxu1 %v828_v20  ;;  %568 = vmatprep.subr.bf16.mxu0 %v716_v0  ;;  %p687_p2 = scmp.ne.s32.totalorder %s384_s3, %s686_s0  ;;  %p692_p4 = scmp.lt.s32.totalorder %s686_s0, %s686_s0 }
  0x33   :  { %592 = vmatprep.subr.bf16.mxu1 %v716_v0 }
  0x34   :  { %p693_p5 = por %p692_p4, %p691_p3 }
  0x35   :  { %570 = vmatpush3.bf16.msra.mxu0 %v569_v25 }
  0x36   :  { %594 = vmatpush3.bf16.msra.mxu1 %v845_v26  ;;  %571 = vmatprep.subr.bf16.mxu0 %v716_v0  ;;  %p694_p6 = pnand %p693_p5, %p687_p2 }
  0x37   :  { %595 = vmatprep.subr.bf16.mxu1 %v716_v0 }
  0x39   :  { %573 = vmatpush3.bf16.msra.mxu0 %v572_v30 }
  0x3a   :  { %597 = vmatpush3.bf16.msra.mxu1 %v596_v32  ;;  %574 = vmatprep.subr.bf16.mxu0 %v716_v0 }
  0x3b   :  { %598 = vmatprep.subr.bf16.mxu1 %v716_v0 }
  0x3d   :  { %576 = vmatpush3.bf16.msra.mxu0 %v575_v36 }
  0x3e   :  { %600 = vmatpush3.bf16.msra.mxu1 %v599_v38  ;;  %577 = vmatprep.subr.bf16.mxu0 %v716_v0 }
  0x3f   :  { %601 = vmatprep.subr.bf16.mxu1 %v716_v0 }
  0x41   :  { %579 = vmatpush3.bf16.msra.mxu0 %v578_v44 }
  0x42   :  { %603 = vmatpush3.bf16.msra.mxu1 %v602_v45  ;;  %580 = vmatprep.subr.bf16.mxu0 %v716_v0 }
  0x43   :  { %604 = vmatprep.subr.bf16.mxu1 %v716_v0 }
  0x45   :  { %582 = vmatpush3.bf16.msra.mxu0 %v581_v50 }
  0x46   :  { %606 = vmatpush3.bf16.msra.mxu1 %v605_v51  ;;  %519 = vmatprep.subr.mxu0 %v718_v43 }
  0x47   :  { %607 = vmatprep.subr.bf16.mxu1 %v716_v0 }
  0xb5   :  { %v48_v52 = vpop.xlane.xlu0 %47 }
  0xb6   :  { %v49_v53 = vsub.f32 %v786_v4, %v48_v52 }
  0xb8   :  { %v50_v54 = vmul.f32 1.442695, %v49_v53 }
  0xba   :  { %640 = vpow2.f32 %v50_v54 }
  0xc4   :  { %v641_v56 = vpop.eup %640 }
  0xc5   :  { %482 = vmatmul.mubr.f32.vlgmr.msra.gmra.mrb[0].mxu0 %v641_v56  ;;  %517 = vmatmul.mubr.f32.vlgmr.msra.gmra.mrb[0].mxu1 %v641_v56 }
  0xc6   :  { %520 = vmatpush3.msra.mxu0 %v226_v55  ;;  %521 = vmatprep.mubr.msk.f32.mxu0 %vm717_vm0, %v718_v43 }
  0xc7   :  { %609 = vmatpush3.bf16.msra.mxu1 %v797_v9  ;;  %556 = vmatprep.mubr.msk.f32.mxu1 %vm717_vm0, %v718_v43 }
  0xc8   :  { %610 = vmatprep.subr.bf16.mxu1 %v716_v0 }
  0xcb   :  { %612 = vmatpush3.bf16.msra.mxu1 %v811_v14 }
  0xcc   :  { %613 = vmatprep.subr.bf16.mxu1 %v716_v0 }
  0xcf   :  { %615 = vmatpush3.bf16.msra.mxu1 %v828_v20 }
  0xd0   :  { %616 = vmatprep.subr.bf16.mxu1 %v716_v0 }
  0xd3   :  { %618 = vmatpush3.bf16.msra.mxu1 %v845_v26 }
  0xd4   :  { %619 = vmatprep.subr.bf16.mxu1 %v716_v0 }
  0xd7   :  { %621 = vmatpush3.bf16.msra.mxu1 %v596_v32 }
  0xd8   :  { %622 = vmatprep.subr.bf16.mxu1 %v716_v0 }
  0xdb   :  { %624 = vmatpush3.bf16.msra.mxu1 %v599_v38 }
  0xdc   :  { %625 = vmatprep.subr.bf16.mxu1 %v716_v0 }
  0xdf   :  { %627 = vmatpush3.bf16.msra.mxu1 %v602_v45 }
  0xe0   :  { %628 = vmatprep.subr.bf16.mxu1 %v716_v0 }
  0xe3   :  { %630 = vmatpush3.bf16.msra.mxu1 %v605_v51 }
 0x198   :  { %v134_v58 = vpop.f32.mrb[0].mxu0  ;;  %v220_v59 = vpop.f32.mrb[0].mxu1 }
 0x199   :  { %v225_v60 = vmul.f32 %v224_v57, %v220_v59  ;;  %v483_v61 = vpop.f32.mrb[1].mxu0  ;;  %v518_v62 = vpop.f32.mrb[1].mxu1 }
 0x19b   :  { %522 = vmatmul.mubr.msk.f32.vlgmr.msra.gmra.mrb[2].mxu0 %vm227_vm1, %v225_v60 }
 0x26e   :  { %v297_v63 = vpop.f32.mrb[2].mxu0 }
 0x26f   :  { %vm301_vm2 = vcmp.lt.f32.partialorder %v134_v58, %v297_v63  ;;  %v523_v1 = vpop.f32.mrb[3].mxu0 }
 0x270   :  { %557 = vmatmul.mubr.msk.f32.vlgmr.msra.gmra.mrb[2].mxu1 %vm301_vm2, %v719_v2 }
 0x343   :  { %v370_v3 = vpop.f32.mrb[2].mxu1 }
 0x344   :  { %v374_v4 = vmin.f32 %v370_v3, 15.0  ;;  %v558_v5 = vpop.f32.mrb[3].mxu1 }
 0x346   :  { %v631_v0 = vtrunc.f32 %v374_v4 }
 0x348   :  { %v632_v6 = vcvt.f32.s32 %v631_v0 }
 0x34a   :  { %376 = vst.msk [vmem:[#allocation7] sm:$0xff] %vm227_vm1, %v632_v6 }
 0x34b   :  { %697 = shalt.err (!%p694_p6)
}
 0x34c   :  { %s698_s27 = scalar_lea.hbm %s941_s5, 128 }
 0x34d   :  { %p699_p7 = scmp.ne.s32.totalorder %s941_s5, %s698_s27  ;;  %p702_p8 = scmp.lt.u32.totalorder %s698_s27, %s941_s5 }
 0x34f   :  { %p704_p9 = pnand %p702_p8, %p699_p7 }
 0x351   :  { %707 = shalt.err (!%p704_p9)
}
 0x352   :  { %386 = dma.vmem_to_hbm [thread:$0]  %s384_s3, 128, %s941_s5, [#allocation4]  }
 0x353   :  { %712 = dma.done.wait [#allocation4], 128  }
 0x354   :  { %713 = vsyncadd [#allocation4], 4294967168 }
 0x355   :  { %390 = vsyncpa [#allocation3], 1 }
 0x356   :  { %391 = vsyncpa [#allocation6], 1 }
 0x357   :  { %392 = vsyncpa [#allocation4], 1 }

</bundles_post_ra>
